<compile_context>
chip_gen: v7x
topology: tpu7x:2x2x1
jax: 0.10.0
libtpu: 0.0.40
codegen_flags: <defaults>
</compile_context>

<pallas_src>
import functools

import jax
import jax.numpy as jnp
from jax.experimental import pallas as pl
from jax.experimental.pallas import tpu as pltpu


# Conservative, generation-safe VMEM budgets.  v7x has 64 MiB physical VMEM per
# TensorCore (v5e/v6e: 128 MiB); 48 MiB scoped limit + <=40 MiB of pipelined
# block buffers leaves headroom everywhere while blocks are far past the
# ~1-4 MiB knee of the HBM-bandwidth roofline.
_VMEM_LIMIT_BYTES = 48 * 1024 * 1024
_FUSED_BUDGET_BYTES = 40 * 1024 * 1024     # 2*(in+out) blocks + 2*W (fused path)
_TWO_PASS_BLOCK_BYTES = 8 * 1024 * 1024    # per streaming block (<=4x double-buffered)


# ----------------------------------------------------------------------------
# Kernels
# ----------------------------------------------------------------------------
def _fused_kernel(x_ref, w_ref, o_ref, *, inv_hw):
    """Single-pass DRS for one batch block with the whole spatial extent resident.

    x_ref: (nb, C, HW);  w_ref: (C, C) PyTorch Linear weight;  o_ref: (nb, C, HW)
    """
    x = jnp.maximum(x_ref[...].astype(jnp.float32), 0.0)            # ReLU
    x_max = jnp.max(x, axis=-1, keepdims=True)                      # (nb, C, 1)
    avg = jnp.sum(x, axis=-1) * inv_hw                              # (nb, C)
    # logits[b, i] = sum_j avg[b, j] * W[i, j]  ==  avg @ W.T
    logits = jax.lax.dot_general(
        avg, w_ref[...].astype(jnp.float32),
        dimension_numbers=(((1,), (1,)), ((), ())),
        preferred_element_type=jnp.float32)
    ctrl = 1.0 / (1.0 + jnp.exp(-logits))                           # sigmoid (EUP)
    thr = x_max * ctrl[:, :, None]                                  # (nb, C, 1)
    o_ref[...] = jnp.minimum(x, thr).astype(o_ref.dtype)


def _make_stats_kernel(hw_tile, hw_true, ragged):
    """Pass 1 of the fallback: per-(b, c) max and sum of relu(x) over HW tiles."""

    def kernel(x_ref, max_ref, sum_ref):
        # x_ref: (nb, C, hw_tile); max_ref/sum_ref: (nb, C, 1), resident over j.
        x = jnp.maximum(x_ref[...].astype(jnp.float32), 0.0)
        if ragged:
            # The last spatial tile over-runs HW: mask the garbage lanes with 0,
            # a valid identity for both max (post-ReLU) and sum.
            pos = jax.lax.broadcasted_iota(jnp.int32, x.shape, 2)
            pos = pos + pl.program_id(1) * hw_tile
            x = jnp.where(pos < hw_true, x, 0.0)
        tile_max = jnp.max(x, axis=-1, keepdims=True)
        tile_sum = jnp.sum(x, axis=-1, keepdims=True)

        @pl.when(pl.program_id(1) == 0)
        def _():
            # relu(x) >= 0, so zero-init is a valid identity for the running max.
            max_ref[...] = jnp.zeros_like(max_ref)
            sum_ref[...] = jnp.zeros_like(sum_ref)

        max_ref[...] = jnp.maximum(max_ref[...], tile_max)
        sum_ref[...] = sum_ref[...] + tile_sum

    return kernel


def _apply_kernel(x_ref, thr_ref, o_ref):
    """Pass 2 of the fallback: out = min(relu(x), threshold) broadcast over HW."""
    x = jnp.maximum(x_ref[...].astype(jnp.float32), 0.0)
    o_ref[...] = jnp.minimum(x, thr_ref[...]).astype(o_ref.dtype)
    # OOB lanes of a ragged output tile are masked on store by Pallas.


# ----------------------------------------------------------------------------
# Tiling helpers
# ----------------------------------------------------------------------------
def _divisors(n):
    return [d for d in range(1, n + 1) if n % d == 0]


def _pick_fused_batch_block(B, per_elem_bytes, w_bytes, override=None):
    """Largest divisor nb of B whose fused footprint fits the VMEM budget.

    Footprint ~= double-buffered in + out blocks (4 * block) + 2 * W.
    Capped at B // 2 so the (parallel) batch grid has >= 2 blocks when B >= 2
    (keeps both v7x TensorCores busy).  Returns None if even nb=1 does not fit.
    """
    cap = max(1, B // 2)

    def fits(nb):
        return 4 * nb * per_elem_bytes + 2 * w_bytes <= _FUSED_BUDGET_BYTES

    if override is not None:
        if B % override == 0 and fits(override):
            return override
        return None
    best = None
    for nb in _divisors(B):
        if nb > cap:
            continue
        if fits(nb):
            best = nb
    return best


def _auto_hw_tile(C, HW, itemsize):
    """Spatial tile for the two-pass path (multiple of 128, or the full HW)."""
    if C * HW * itemsize <= _TWO_PASS_BLOCK_BYTES or HW < 128:
        return HW                                # full extent: always a legal block dim
    cap = max(128, (_TWO_PASS_BLOCK_BYTES // (C * itemsize)) // 128 * 128)
    if HW % 128 == 0:
        # Largest multiple-of-128 divisor of HW that fits the cap (uniform tiles).
        k = HW // 128
        best = 128
        for d in range(1, k + 1):
            if k % d == 0 and 128 * d <= cap:
                best = 128 * d
        return best
    # Ragged: largest multiple of 128 <= cap; the tail tile is masked in-kernel.
    return min(cap, (HW // 128) * 128)


def _auto_batch_block(B, block_bytes):
    """Largest divisor of B (capped at B//2) keeping one block within budget."""
    cap = max(1, B // 2)
    best = 1
    for nb in _divisors(B):
        if nb > cap:
            continue
        if nb * block_bytes <= _TWO_PASS_BLOCK_BYTES:
            best = nb
    return best


# ----------------------------------------------------------------------------
# Wrapper
# ----------------------------------------------------------------------------
def drs_learnable(x, w, *, force_two_pass=False, hw_tile=None, batch_block=None):
    """x: (B, C, H, W), w: (C, C) -> (B, C, H, W) with x's dtype."""
    B, C, H, W_sp = x.shape
    HW = H * W_sp
    itemsize = jnp.dtype(x.dtype).itemsize
    w_bytes = C * C * jnp.dtype(w.dtype).itemsize
    xr = x.reshape(B, C, HW)                     # free reshape; no pad, no copy

    # ---------------- fused single-pass fast path ----------------------------
    nb_fused = None
    if not force_two_pass:
        nb_fused = _pick_fused_batch_block(B, C * HW * itemsize, w_bytes,
                                           override=batch_block)
    if nb_fused is not None:
        nb = nb_fused
        n_b = B // nb
        out = pl.pallas_call(
            functools.partial(_fused_kernel, inv_hw=1.0 / HW),
            out_shape=jax.ShapeDtypeStruct((B, C, HW), x.dtype),
            grid_spec=pltpu.PrefetchScalarGridSpec(
                num_scalar_prefetch=0,
                grid=(n_b,),
                in_specs=[pl.BlockSpec((nb, C, HW), lambda i: (i, 0, 0)),
                          pl.BlockSpec((C, C), lambda i: (0, 0))],
                out_specs=pl.BlockSpec((nb, C, HW), lambda i: (i, 0, 0)),
            ),
            compiler_params=pltpu.CompilerParams(
                dimension_semantics=("parallel",),
                vmem_limit_bytes=_VMEM_LIMIT_BYTES),
        )(xr, w)
        return out.reshape(B, C, H, W_sp)

    # ---------------- two-pass streaming fallback (big feature maps) ---------
    if hw_tile is None:
        hw_tile = _auto_hw_tile(C, HW, itemsize)
    if hw_tile != HW:
        assert hw_tile % 128 == 0, "hw_tile must be a multiple of 128 or the full HW"
    ragged = (HW % hw_tile) != 0
    if batch_block is None:
        batch_block = _auto_batch_block(B, C * hw_tile * itemsize)
    nb = batch_block
    assert B % nb == 0, "batch_block must divide the batch size"
    n_b = B // nb
    n_hw = pl.cdiv(HW, hw_tile)

    # Pass 1: per-(b, c) max and sum over the (tiled) spatial axis.
    x_max, x_sum = pl.pallas_call(
        _make_stats_kernel(hw_tile, HW, ragged),
        out_shape=(jax.ShapeDtypeStruct((B, C, 1), jnp.float32),
                   jax.ShapeDtypeStruct((B, C, 1), jnp.float32)),
        grid_spec=pltpu.PrefetchScalarGridSpec(
            num_scalar_prefetch=0,
            grid=(n_b, n_hw),
            in_specs=[pl.BlockSpec((nb, C, hw_tile), lambda i, j: (i, 0, j))],
            out_specs=(pl.BlockSpec((nb, C, 1), lambda i, j: (i, 0, 0)),
                       pl.BlockSpec((nb, C, 1), lambda i, j: (i, 0, 0))),
        ),
        compiler_params=pltpu.CompilerParams(
            dimension_semantics=("parallel", "arbitrary"),
            vmem_limit_bytes=_VMEM_LIMIT_BYTES),
    )(xr)

    # Tiny (B, C) control math stays in plain XLA (no extra kernel launch):
    # thr = x_max * sigmoid( (sum / HW) @ W^T )
    avg = x_sum[:, :, 0] * (1.0 / HW)
    logits = jax.lax.dot_general(
        avg, w.astype(jnp.float32),
        dimension_numbers=(((1,), (1,)), ((), ())),
        precision=jax.lax.Precision.HIGHEST)
    thr = (x_max[:, :, 0] * jax.nn.sigmoid(logits))[:, :, None]      # (B, C, 1) f32

    # Pass 2: out = min(relu(x), threshold), fully parallel grid.
    out = pl.pallas_call(
        _apply_kernel,
        out_shape=jax.ShapeDtypeStruct((B, C, HW), x.dtype),
        grid_spec=pltpu.PrefetchScalarGridSpec(
            num_scalar_prefetch=0,
            grid=(n_b, n_hw),
            in_specs=[pl.BlockSpec((nb, C, hw_tile), lambda i, j: (i, 0, j)),
                      pl.BlockSpec((nb, C, 1), lambda i, j: (i, 0, 0))],
            out_specs=pl.BlockSpec((nb, C, hw_tile), lambda i, j: (i, 0, j)),
        ),
        compiler_params=pltpu.CompilerParams(
            dimension_semantics=("parallel", "parallel"),
            vmem_limit_bytes=_VMEM_LIMIT_BYTES),
    )(xr, thr)

    return out.reshape(B, C, H, W_sp)


# ----------------------------------------------------------------------------
# Pure-JAX reference
# ----------------------------------------------------------------------------
def _reference(x, w):
    xf = jnp.maximum(x.astype(jnp.float32), 0.0)
    x_max = jnp.max(xf, axis=(2, 3), keepdims=True)
    avg = jnp.mean(xf, axis=(2, 3))                                   # (B, C)
    logits = jax.lax.dot_general(
        avg, w.astype(jnp.float32),
        dimension_numbers=(((1,), (1,)), ((), ())),
        precision=jax.lax.Precision.HIGHEST)
    ctrl = jax.nn.sigmoid(logits)[:, :, None, None]                   # (B, C, 1, 1)
    return jnp.minimum(xf, x_max * ctrl).astype(x.dtype)


if __name__ == "__main__":
    key = jax.random.PRNGKey(0)
    k1, k2, k3, k4 = jax.random.split(key, 4)

    # Case 1: fused single-pass path (auto), lane-aligned HW (16*16 = 256).
    B, C, H, W = 2, 64, 16, 16
    x = jax.random.normal(k1, (B, C, H, W), dtype=jnp.float32)
    w = (jax.random.uniform(k2, (C, C), dtype=jnp.float32) - 0.5) * (2.0 / (C ** 0.5))
    out = jax.block_until_ready(drs_learnable(x, w))
    assert out.shape == (B, C, H, W)
    assert jnp.allclose(out, _reference(x, w), atol=5e-3, rtol=5e-3)

    # Case 2: two-pass streaming fallback with a ragged spatial tail
    # (HW = 196 = 128 + 68): cdiv grid + in-kernel masking + batch blocking.
    B2, C2, H2, W2 = 2, 64, 14, 14
    x2 = jax.random.normal(k3, (B2, C2, H2, W2), dtype=jnp.float32)
    w2 = (jax.random.uniform(k4, (C2, C2), dtype=jnp.float32) - 0.5) * (2.0 / (C2 ** 0.5))
    out2 = jax.block_until_ready(
        drs_learnable(x2, w2, force_two_pass=True, hw_tile=128, batch_block=1))
    assert out2.shape == (B2, C2, H2, W2)
    assert jnp.allclose(out2, _reference(x2, w2), atol=1e-5, rtol=1e-5)

    # Case 3: bf16 activations straight through the fused path (f32 internal math).
    x3 = x2.astype(jnp.bfloat16)
    out3 = jax.block_until_ready(drs_learnable(x3, w2))
    assert out3.shape == (B2, C2, H2, W2) and out3.dtype == jnp.bfloat16
    assert jnp.allclose(out3.astype(jnp.float32),
                        _reference(x3, w2).astype(jnp.float32),
                        atol=2e-2, rtol=2e-2)

    print("KERNEL_OK")
</pallas_src>

<mosaic_0001>
module attributes {stable_mosaic.version = 11 : i64} {
  func.func @_fused_kernel(%arg0: i32, %arg1: memref<1x64x256xf32, #tpu.memory_space<vmem>>, %arg2: memref<64x64xf32, #tpu.memory_space<vmem>>, %arg3: memref<1x64x256xf32, #tpu.memory_space<vmem>>) attributes {dimension_semantics = [#tpu.dimension_semantics<parallel>], iteration_bounds = array<i64: 2>, scalar_prefetch = 0 : i64, scratch_operands = 0 : i64, tpu.core_type = #tpu.core_type<tc>, window_params = [{transform_indices = @transform_0, window_bounds = array<i64: 1, 64, 256>}, {pipeline_mode = #tpu.pipeline_mode<synchronous>, transform_indices = @transform_1, window_bounds = array<i64: 64, 64>}, {transform_indices = @transform_2, window_bounds = array<i64: 1, 64, 256>}]} {
    %c0 = arith.constant 0 : index
    %c0_0 = arith.constant 0 : index
    %c0_1 = arith.constant 0 : index
    %0 = vector.load %arg1[%c0, %c0_0, %c0_1] : memref<1x64x256xf32, #tpu.memory_space<vmem>>, vector<1x64x256xf32>
    %cst = arith.constant 0.000000e+00 : f32
    %1 = vector.broadcast %cst : f32 to vector<1x64x256xf32>
    %2 = arith.maximumf %0, %1 : vector<1x64x256xf32>
    %cst_2 = arith.constant dense<0xFF800000> : vector<1x64xf32>
    %3 = vector.multi_reduction <maximumf>, %2, %cst_2 [2] : vector<1x64x256xf32> to vector<1x64xf32>
    %4 = vector.shape_cast %3 : vector<1x64xf32> to vector<1x64x1xf32>
    %cst_3 = arith.constant dense<0.000000e+00> : vector<1x64xf32>
    %5 = vector.multi_reduction <add>, %2, %cst_3 [2] : vector<1x64x256xf32> to vector<1x64xf32>
    %cst_4 = arith.constant 3.906250e-03 : f32
    %6 = vector.broadcast %cst_4 : f32 to vector<1x64xf32>
    %7 = arith.mulf %5, %6 : vector<1x64xf32>
    %c0_5 = arith.constant 0 : index
    %c0_6 = arith.constant 0 : index
    %8 = vector.load %arg2[%c0_5, %c0_6] : memref<64x64xf32, #tpu.memory_space<vmem>>, vector<64x64xf32>
    %cst_7 = arith.constant dense<0.000000e+00> : vector<1x64xf32>
    %9 = tpu.matmul %7, %8, %cst_7 {dimension_numbers = #tpu.dot_dimension_numbers<[1], [1], [0], [0], [0, 0, 1, 0], [], []>} : vector<1x64xf32>, vector<64x64xf32>, vector<1x64xf32> -> vector<1x64xf32>
    %cst_8 = arith.constant 0.000000e+00 : f32
    %10 = vector.broadcast %cst_8 : f32 to vector<1x64xf32>
    %11 = arith.subf %10, %9 : vector<1x64xf32>
    %12 = math.exp %11 : vector<1x64xf32>
    %cst_9 = arith.constant 1.000000e+00 : f32
    %13 = vector.broadcast %cst_9 : f32 to vector<1x64xf32>
    %14 = arith.addf %13, %12 : vector<1x64xf32>
    %cst_10 = arith.constant 1.000000e+00 : f32
    %15 = vector.broadcast %cst_10 : f32 to vector<1x64xf32>
    %16 = arith.divf %15, %14 : vector<1x64xf32>
    %17 = vector.shape_cast %16 : vector<1x64xf32> to vector<1x64x1xf32>
    %18 = arith.mulf %4, %17 : vector<1x64x1xf32>
    %19 = vector.broadcast %18 : vector<1x64x1xf32> to vector<1x64x256xf32>
    %20 = arith.minimumf %2, %19 : vector<1x64x256xf32>
    %c0_11 = arith.constant 0 : index
    %c0_12 = arith.constant 0 : index
    %c0_13 = arith.constant 0 : index
    %21 = vector.load %arg3[%c0_11, %c0_12, %c0_13] : memref<1x64x256xf32, #tpu.memory_space<vmem>>, vector<1x64x256xf32>
    tpu.vector_store %arg3[%c0_11, %c0_12, %c0_13], %20 {strides = array<i32>} : memref<1x64x256xf32, #tpu.memory_space<vmem>>, vector<1x64x256xf32>,
    return
  }
  func.func @transform_0(%arg0: i32) -> (i32, i32, i32) {
    %c0_i32 = arith.constant 0 : i32
    %c0_i32_0 = arith.constant 0 : i32
    %c0_i32_1 = arith.constant 0 : i32
    return %arg0, %c0_i32, %c0_i32_0 : i32, i32, i32
  }
  func.func @transform_1(%arg0: i32) -> (i32, i32) {
    %c0_i32 = arith.constant 0 : i32
    %c0_i32_0 = arith.constant 0 : i32
    %c0_i32_1 = arith.constant 0 : i32
    return %c0_i32, %c0_i32_0 : i32, i32
  }
  func.func @transform_2(%arg0: i32) -> (i32, i32, i32) {
    %c0_i32 = arith.constant 0 : i32
    %c0_i32_0 = arith.constant 0 : i32
    %c0_i32_1 = arith.constant 0 : i32
    return %arg0, %c0_i32, %c0_i32_0 : i32, i32, i32
  }
}

</mosaic_0001>

<bundles_post_ra>
// kernel: tpu_custom_call.1
= control target key start
LH: loop header
LB: loop body
LE: loop exit
PB: predicated region body
PF: predicated region fallthrough
CT: control target
= control target key end

     0   :  { %7 = vsyncpa [#allocation3], 0  ;;  %s1262_s0 = inlined_call_operand.hbm [shape: f32[2,64,256], index: 0, kind: input, shape index: {}]   ;;  %s1263_s1 = inlined_call_operand.hbm [shape: f32[64,64], index: 1, kind: input, shape index: {}]   ;;  %s1264_s2 = inlined_call_operand.hbm [shape: f32[2,64,256], index: 2, kind: output, shape index: {}]  }
   0x1   :  { %9 = vsyncpa [#allocation3 + $0x1], 0 }
   0x2   :  { %10 = vsyncpa [#allocation6], 0 }
   0x3   :  { %11 = vsyncpa [#allocation4], 0 }
   0x4   :  { %13 = vsyncpa [#allocation4 + $0x1], 0  ;;  %s909_s9 = smov 0   ;;  %s911_s10 = smov 0  }
   0x5   :  { %s913_s11 = smov 0   ;;  %s915_s12 = smov 0  }
   0x6 LB: > { %s930_s13 = sadd.s32 4294967295, %s880_s12   ;;  %s611_s14 = sadd.s32 4294967294, %s880_s12   ;;  %s880_s12 = sphi %s915_s12, %s1286_s12   ;;  %s876_s11 = sphi %s913_s11, %s1285_s11   ;;  %s872_s10 = sphi %s911_s10, %s1284_s10   ;;  %s868_s9 = sphi %s909_s9, %s1283_s9  }
   0x7   : > { %p39_p0 = scmp.ne.s32.totalorder %s872_s10, %s868_s9  ;;  %p1265_p1 = scmp.eq.s32.totalorder %s930_s13, 0 }
   0x8   : > { %p90_p3 = scmp.eq.s32.totalorder %s611_s14, 1  ;;  %p612_p5 = scmp.ge.s32.totalorder %s880_s12, 1 }
   0x9   : > { %p939_p4 = por %p1265_p1, %p39_p0  ;;  %p97_p7 = scmp.lt.s32.totalorder %s880_s12, 3 }
   0xa   : > { %p944_p6 = por %p90_p3, %p39_p0  ;;  %s882_s18 = smov [#allocation5]  }
   0xb   : > { %s1268_s15 = scalar_select %p939_p4, 1, 0 }
   0xc   : > { %s1269_s16 = scalar_select %p944_p6, 1, 0 }
   0xd   : > { %p949_p8 = pnand %p612_p5, %p97_p7  ;;  %s109_s19 = sshll.u32 %s882_s18, 4  ;;  %s953_s19 = int_to_ptr.vmem [resolvable:$true] %s109_s19 }
   0xe   : > { %s965_s21 = sadd.s32 1, %s880_s12   ;;  %s26_s22 = sadd.s32 1, %s876_s11 }
   0xf   : > { %s1270_s17 = scalar_select %p949_p8, 1, 0 }
  0x10   : > { %p690_p9 = pneg %p949_p8  ;;  %s23_s23 = ssub.s32 %s880_s12, %s965_s21 }
  0x11   : > { %s752_s26 = scalar_lea.hbm %s1263_s1, 1024 }
  0x12   : > { %p960_p11 = pnand %p690_p9, %p1265_p1  ;;  %p753_p12 = scmp.ne.s32.totalorder %s1263_s1, %s752_s26 }
  0x13   : > { %p759_p5 = scmp.lt.u32.totalorder %s752_s26, %s1263_s1 }
  0x14   : > { %p754_p13 = pneg %p960_p11 }
  0x16   : > { %p755_p0 = pnand %p754_p13, %p753_p12 }
  0x18   : > { %p756_p3 = pneg %p755_p0 }
  0x1a   : > { %p761_p7 = pnand %p759_p5, %p756_p3 }
  0x1c   : > { %764 = shalt.err (!%p761_p7)
}
  0x1d   : > { %s765_s3 = scalar_lea.vmem %s953_s19, 1024  ;;  %p773_p2 = scmp.lt.s32.totalorder %s953_s19, %s953_s19 }
  0x1e   : > { %p766_p9 = scmp.ne.s32.totalorder %s953_s19, %s765_s3  ;;  %p774_p6 = scmp.lt.s32.totalorder %s765_s3, %s765_s3 }
  0x20   : > { %p768_p10 = pnand %p766_p9, %p754_p13  ;;  %p775_p4 = por %p774_p6, %p773_p2 }
  0x22   : > { %p769_p1 = pneg %p768_p10 }
  0x24   : > { %p776_p8 = pnand %p775_p4, %p769_p1 }
  0x26   : > { %779 = shalt.err (!%p776_p8)
}
  0x27   : > { %s883_s4 = smov 128   ;;  %s884_s5 = smov 8  }
  0x28   : > { %693 = dma.hbm_to_vmem [thread:$0]  (!%p960_p11), %s1263_s1, 1024, %s953_s19, [#allocation6], %s883_s4, %s883_s4, %s884_s5  }
  0x29   : > { %p24_p2 = scmp.eq.s32.totalorder %s23_s23, 0  ;;  %p33_p1 = scmp.ne.s32.totalorder %s876_s11, %s872_s10 }
  0x2a   : > { %p34_p4 = scmp.eq.s32.totalorder %s880_s12, 0  ;;  %p703_p6 = scmp.lt.s32.totalorder %s880_s12, 2 }
  0x2b   : > { %s996_s8 = scalar_select %p24_p2, %s876_s11, %s26_s22  }
  0x2c   : > { %p35_p8 = por %p34_p4, %p33_p1  ;;  %p1272_p10 = scmp.eq.s32.totalorder %s930_s13, 1 }
  0x2d   : > { %s123_s18 = sand.u32 1, %s876_s11   ;;  %s636_s24 = sshll.u32 %s880_s12, 11 }
  0x2e   : > { %p1000_p12 = por %p1272_p10, %p33_p1  ;;  %s615_s25 = sshll.u32 %s123_s18, 7 }
  0x2f   : > { %s1009_s27 = scalar_lea.hbm %s1262_s0, %s636_s24  ;;  %s127_s19 = scalar_lea.vmem [#allocation2], %s615_s25 }
  0x30   : > { %s134_s22 = sshll.u32 %s127_s19, 4  ;;  %p1011_p11 = pnand %p703_p6, %p35_p8  ;;  %s1015_s22 = int_to_ptr.vmem [resolvable:$true] %s134_s22 }
  0x31   : > { %s1017_s28 = scalar_lea.sflag [#allocation3], %s123_s18  ;;  %s780_s29 = scalar_lea.hbm %s1009_s27, 2048 }
  0x32   : > { %p781_p13 = scmp.ne.s32.totalorder %s1009_s27, %s780_s29  ;;  %p782_p0 = pneg %p1011_p11 }
  0x33   : > { %s785_s4 = scalar_lea.hbm %s1262_s0, 4096  ;;  %p786_p7 = scmp.lt.u32.totalorder %s1009_s27, %s1262_s0 }
  0x34   : > { %p783_p3 = pnand %p782_p0, %p781_p13  ;;  %p787_p9 = scmp.lt.u32.totalorder %s785_s4, %s780_s29 }
  0x35   : > { %p789_p1 = scmp.lt.u32.totalorder %s780_s29, %s1009_s27 }
  0x36   : > { %p784_p5 = pneg %p783_p3  ;;  %p788_p2 = por %p787_p9, %p786_p7 }
  0x38   : > { %p790_p4 = por %p789_p1, %p788_p2 }
  0x3a   : > { %p791_p6 = pnand %p790_p4, %p784_p5 }
  0x3c   : > { %794 = shalt.err (!%p791_p6)
}
  0x3d   : > { %s795_s7 = scalar_lea.vmem %s1015_s22, 2048  ;;  %s885_s18 = smov [#allocation2]  }
  0x3e   : > { %p796_p8 = scmp.ne.s32.totalorder %s1015_s22, %s795_s7  ;;  %s800_s24 = sshll.u32 %s885_s18, 4  ;;  %s801_s24 = int_to_ptr.vmem [resolvable:$false] %s800_s24 }
  0x3f   : > { %s802_s25 = scalar_lea.vmem %s801_s24, 4096  ;;  %p803_p3 = scmp.lt.s32.totalorder %s1015_s22, %s801_s24 }
  0x40   : > { %p798_p10 = pnand %p796_p8, %p782_p0  ;;  %p804_p7 = scmp.lt.s32.totalorder %s802_s25, %s795_s7 }
  0x42   : > { %p799_p13 = pneg %p798_p10  ;;  %p805_p9 = por %p804_p7, %p803_p3 }
  0x44   : > { %p806_p2 = pnand %p805_p9, %p799_p13 }
  0x46   : > { %809 = shalt.err (!%p806_p2)
}
  0x47   : > { %s886_s20 = smov 256   ;;  %s887_s26 = smov 16  }
  0x48   : > { %697 = dma.hbm_to_vmem [thread:$0]  (!%p1011_p11), %s1009_s27, 2048, %s1015_s22, %s1017_s28, %s886_s20, %s886_s20, %s887_s26  }
  0x49   : > { %p1275_p0 = scmp.ne.s32.totalorder %s1270_s17, 0 }
  0x4a   : > { %s1048_s19 = sand.u32 (!%p1275_p0), 1, %s872_s10   ;;  %p1276_p5 = scmp.ne.s32.totalorder (!%p1275_p0), %s1268_s15, 0 }
  0x4b   : > { %146 = sbr.rel (%p1275_p0) target bundleno = 643 (0x283), region = 28  ;;  %s619_s29 = sshll.u32 (!%p1275_p0), %s1048_s19, 7 }
  0x4c   : > { %s149_s30 = scalar_lea.sflag (!%p1275_p0), [#allocation3], %s1048_s19  ;;  %s1054_s3 = scalar_lea.vmem (!%p1275_p0), [#allocation2], %s619_s29 }
  0x52   : > { %855 = dma.done.wait (%p1276_p5), %s149_s30, 2048  }
  0x53   : > { %857 = vsyncadd (%p1276_p5), %s149_s30, 4294965248  ;;  %p1277_p11 = scmp.eq.s32.totalorder %s930_s13, 0 }
  0x55   : > { %859 = dma.done.wait (%p1277_p11), [#allocation6], 1024   ;;  %p1278_p1 = pmov %p1277_p11 }
  0x56   : > { %v888_v0 = vmov 0.0|0.0   ;;  %v177_v1 = vld [vmem:[%s1054_s3] sm:$0xff]  ;;  %v178_v2 = vld [vmem:[%s1054_s3 + $0x8] sm:$0xff]  ;;  %vm336_vm0 = vcmask 523264   ;;  %v179_v8 = vld [vmem:[%s1054_s3 + $0x10] sm:$0xff]  ;;  %vm889_vm2 = vmmov 0   ;;  %v281_v62 = vlaneseq }
  0x57   : > { %861 = vsyncadd (%p1278_p1), [#allocation6], 4294966272  ;;  %666 = vmatprep.subr.bf16.mxu0 %v888_v0  ;;  %v181_v3 = vld [vmem:[%s1054_s3 + $0x20] sm:$0xff]  ;;  %v1068_v4 = vmax.f32 %v177_v1, 0.0  ;;  %v1070_v5 = vmax.f32 %v178_v2, 0.0  ;;  %v182_v6 = vld [vmem:[%s1054_s3 + $0x28] sm:$0xff] }
  0x58   : > { %v1073_v7 = vmax.f32 %v181_v3, 0.0  ;;  %v180_v9 = vld [vmem:[%s1054_s3 + $0x18] sm:$0xff]  ;;  %v1077_v10 = vmax.f32 %v182_v6, 0.0  ;;  %v1079_v11 = vmax.f32 %v179_v8, 0.0  ;;  %v183_v13 = vld [vmem:[%s1054_s3 + $0x30] sm:$0xff]  ;;  %v185_v15 = vld [vmem:[%s1054_s3 + $0x40] sm:$0xff] }
  0x59   : > { %v1081_v12 = vmax.f32 %v180_v9, 0.0  ;;  %v184_v14 = vld [vmem:[%s1054_s3 + $0x38] sm:$0xff]  ;;  %v233_v16 = vadd.f32 %v1070_v5, %v1068_v4  ;;  %v1088_v17 = vmax.f32 %v183_v13, 0.0  ;;  %v186_v19 = vld [vmem:[%s1054_s3 + $0x48] sm:$0xff]  ;;  %v187_v20 = vld [vmem:[%s1054_s3 + $0x50] sm:$0xff]  ;;  %v1099_v24 = vmax.f32 %v185_v15, 0.0 }
  0x5a   : > { %v1090_v18 = vmax.f32 %v184_v14, 0.0  ;;  %v188_v21 = vld [vmem:[%s1054_s3 + $0x58] sm:$0xff]  ;;  %v239_v22 = vadd.f32 %v1077_v10, %v1073_v7  ;;  %v1101_v25 = vmax.f32 %v186_v19, 0.0  ;;  %v265_v26 = vld [vmem:[#allocation5] sm:$0xff]  ;;  %v266_v27 = vld [vmem:[#allocation5 + $0x8] sm:$0xff]  ;;  %v1111_v30 = vmax.f32 %v187_v20, 0.0 }
  0x5b   : > { %234 = vadd.xlane.f32.xlu0 %v233_v16  ;;  %v236_v23 = vadd.f32 %v1081_v12, %v1079_v11  ;;  %vm1105_vm1 = vmpackc.low %vm336_vm0, %vm336_vm0  ;;  %v1113_v31 = vmax.f32 %v188_v21, 0.0  ;;  %v189_v32 = vld [vmem:[%s1054_s3 + $0x60] sm:$0xff]  ;;  %v190_v33 = vld [vmem:[%s1054_s3 + $0x68] sm:$0xff]  ;;  %v667_v34 = vpack.c.bf16 %v266_v27, %v265_v26  ;;  %v890_v54 = vmov 0.0   ;;  %s1181_s15 = scalar_lea.vmem [#allocation7], %s619_s29  ;;  %s637_s17 = sshll.u32 %s930_s13, 11 }
  0x5c   : > { %240 = vadd.xlane.f32.xlu1 %v239_v22  ;;  %v242_v29 = vadd.f32 %v1090_v18, %v1088_v17  ;;  %v191_v35 = vld [vmem:[%s1054_s3 + $0x70] sm:$0xff]  ;;  %v192_v36 = vld [vmem:[%s1054_s3 + $0x78] sm:$0xff]  ;;  %v245_v37 = vadd.f32 %v1101_v25, %v1099_v24  ;;  %v1123_v38 = vmax.f32 %v189_v32, 0.0  ;;  %v1125_v39 = vmax.f32 %v190_v33, 0.0  ;;  %v269_v48 = vld [vmem:[#allocation5 + $0x20] sm:$0xff]  ;;  %663 = vmatprep.mubr.msk.f32.mxu0 %vm889_vm2, %v890_v54  ;;  %s528_s27 = sshll.u32 %s1181_s15, 4  ;;  %s1212_s28 = scalar_lea.hbm %s1264_s2, %s637_s17  ;;  %s1214_s27 = int_to_ptr.vmem [resolvable:$true] %s528_s27 }
  0x5d   : > { %669 = vmatpush3.bf16.xpose.msk.msra.mxu0 %vm1105_vm1, %v667_v34  ;;  %v267_v40 = vld [vmem:[#allocation5 + $0x10] sm:$0xff]  ;;  %v268_v41 = vld [vmem:[#allocation5 + $0x18] sm:$0xff]  ;;  %v248_v42 = vadd.f32 %v1113_v31, %v1111_v30  ;;  %v1130_v43 = vmax.f32 %v191_v35, 0.0  ;;  %v1132_v44 = vmax.f32 %v192_v36, 0.0  ;;  %v270_v49 = vld [vmem:[#allocation5 + $0x28] sm:$0xff]  ;;  %v212_v55 = vmax.f32 %v1079_v11, %v1081_v12  ;;  %s515_s13 = scalar_lea.sflag [#allocation4], %s1048_s19 }
  0x5e   : > { %670 = vmatprep.subr.bf16.mxu0 %v888_v0  ;;  %v671_v45 = vpack.c.bf16 %v268_v41, %v267_v40  ;;  %v251_v46 = vadd.f32 %v1125_v39, %v1123_v38  ;;  %v675_v50 = vpack.c.bf16 %v270_v49, %v269_v48  ;;  %v271_v51 = vld [vmem:[#allocation5 + $0x30] sm:$0xff]  ;;  %v272_v52 = vld [vmem:[#allocation5 + $0x38] sm:$0xff]  ;;  %v209_v56 = vmax.f32 %v1068_v4, %v1070_v5  ;;  %s810_s4 = scalar_lea.vmem %s1214_s27, 2048  ;;  %s891_s5 = smov [#allocation7]  }
  0x5f   : > { %237 = vadd.xlane.f32.xlu0 %v236_v23  ;;  %v254_v47 = vadd.f32 %v1132_v44, %v1130_v43  ;;  %v679_v53 = vpack.c.bf16 %v272_v52, %v271_v51  ;;  %v218_v57 = vmax.f32 %v1088_v17, %v1090_v18  ;;  %v215_v58 = vmax.f32 %v1073_v7, %v1077_v10  ;;  %p811_p4 = scmp.ne.s32.totalorder %s1214_s27, %s810_s4  ;;  %s814_s6 = sshll.u32 %s891_s5, 4  ;;  %s815_s6 = int_to_ptr.vmem [resolvable:$false] %s814_s6 }
  0x60   : > { %243 = vadd.xlane.f32.xlu1 %v242_v29  ;;  %v224_v59 = vmax.f32 %v1111_v30, %v1113_v31  ;;  %v221_v60 = vmax.f32 %v1099_v24, %v1101_v25  ;;  %v230_v61 = vmax.f32 %v1130_v43, %v1132_v44  ;;  %v282_v63 = vand.u32 127, %v281_v62  ;;  %s816_s7 = scalar_lea.vmem %s815_s6, 4096  ;;  %p817_p10 = scmp.lt.s32.totalorder %s1214_s27, %s815_s6 }
  0x61   : > { %vm292_vm3 = vcmask 130112   ;;  %vm299_vm4 = vcmask 195712   ;;  %vm306_vm5 = vcmask 261312   ;;  %vm313_vm6 = vcmask 326912   ;;  %p812_p6 = pnand %p811_p4, %p1000_p12  ;;  %p818_p13 = scmp.lt.s32.totalorder %s816_s7, %s810_s4 }
  0x62   : > { %v287_v1 = vadd.s32 4294967288, %v282_v63  ;;  %v294_v3 = vadd.s32 4294967280, %v282_v63  ;;  %v301_v6 = vadd.s32 4294967272, %v282_v63  ;;  %v308_v15 = vadd.s32 4294967264, %v282_v63 }
  0x63   : > { %246 = vadd.xlane.f32.xlu0 %v245_v37  ;;  %v315_v22 = vadd.s32 4294967256, %v282_v63  ;;  %v322_v33 = vadd.s32 4294967248, %v282_v63  ;;  %v329_v40 = vadd.s32 4294967240, %v282_v63  ;;  %vm320_vm7 = vcmask 392512   ;;  %p813_p8 = pneg %p812_p6  ;;  %p819_p3 = por %p818_p13, %p817_p10 }
  0x64   : > { %249 = vadd.xlane.f32.xlu1 %v248_v42  ;;  %vm327_vm8 = vcmask 458112   ;;  %vm334_vm9 = vcmask 523712  }
  0x65   : > { %673 = vmatpush3.bf16.xpose.msk.msra.mxu0 %vm1105_vm1, %v671_v45  ;;  %p820_p7 = pnand %p819_p3, %p813_p8 }
  0x66   : > { %674 = vmatprep.subr.bf16.mxu0 %v888_v0 }
  0x67   : > { %252 = vadd.xlane.f32.xlu0 %v251_v46 }
  0x68   : > { %255 = vadd.xlane.f32.xlu1 %v254_v47 }
  0x6b   : > { %210 = vmax.xlane.f32.xlu0 %v209_v56 }
  0x6c   : > { %213 = vmax.xlane.f32.xlu1 %v212_v55 }
  0x6d   : > { %677 = vmatpush3.bf16.xpose.msk.msra.mxu0 %vm1105_vm1, %v675_v50 }
  0x6e   : > { %678 = vmatprep.subr.bf16.mxu0 %v888_v0  ;;  %v1160_v0 = vshrl.u32 %v281_v62, 7 }
  0x6f   : > { %216 = vmax.xlane.f32.xlu0 %v215_v58 }
  0x70   : > { %219 = vmax.xlane.f32.xlu1 %v218_v57  ;;  %v285_v9 = vsub.s32 %v282_v63, %v1160_v0  ;;  %v290_v14 = vsub.s32 %v287_v1, %v1160_v0  ;;  %v297_v16 = vsub.s32 %v294_v3, %v1160_v0  ;;  %v304_v21 = vsub.s32 %v301_v6, %v1160_v0 }
  0x71   : > { %v311_v32 = vsub.s32 %v308_v15, %v1160_v0  ;;  %v318_v37 = vsub.s32 %v315_v22, %v1160_v0  ;;  %v325_v50 = vsub.s32 %v322_v33, %v1160_v0  ;;  %v227_v63 = vmax.f32 %v1123_v38, %v1125_v39 }
  0x73   : > { %222 = vmax.xlane.f32.xlu0 %v221_v60 }
  0x74   : > { %225 = vmax.xlane.f32.xlu1 %v224_v59 }
  0x75   : > { %681 = vmatpush3.bf16.xpose.msk.msra.mxu0 %vm1105_vm1, %v679_v53  ;;  %v332_v53 = vsub.s32 %v329_v40, %v1160_v0 }
  0x77   : > { %228 = vmax.xlane.f32.xlu0 %v227_v63 }
  0x78   : > { %231 = vmax.xlane.f32.xlu1 %v230_v61 }
  0xe8   : > { %v235_v2 = vpop.xlane.xlu0 %234 }
  0xe9   : > { %v241_v8 = vpop.xlane.xlu1 %240  ;;  %v257_v13 = vmul.f32 0.00390625, %v235_v2 }
  0xea   : > { %v259_v19 = vmul.f32 0.00390625, %v241_v8 }
  0xeb   : > { %v286_v28 = vrot.slane %v257_v13, %v285_v9  ;;  %v441_v13 = vsub.s32 0, %v1160_v0 }
  0xec   : > { %v238_v20 = vpop.xlane.xlu0 %237  ;;  %v298_v34 = vrot.slane %v259_v19, %v297_v16 }
  0xed   : > { %v258_v23 = vmul.f32 0.00390625, %v238_v20  ;;  %v244_v26 = vpop.xlane.xlu1 %243 }
  0xee   : > { %v260_v27 = vmul.f32 0.00390625, %v244_v26 }
  0xef   : > { %v291_v29 = vrot.slane %v258_v23, %v290_v14 }
  0xf0   : > { %v305_v35 = vrot.slane %v260_v27, %v304_v21  ;;  %v247_v36 = vpop.xlane.xlu0 %246 }
  0xf1   : > { %v293_v41 = vsel %vm292_vm3, %v291_v29, %v286_v28  ;;  %v261_v42 = vmul.f32 0.00390625, %v247_v36  ;;  %v250_v45 = vpop.xlane.xlu1 %249 }
  0xf2   : > { %v300_v46 = vsel %vm299_vm4, %v298_v34, %v293_v41  ;;  %v262_v47 = vmul.f32 0.00390625, %v250_v45 }
  0xf3   : > { %v307_v48 = vsel %vm306_vm5, %v305_v35, %v300_v46  ;;  %v312_v49 = vrot.slane %v261_v42, %v311_v32 }
  0xf4   : > { %v319_v51 = vrot.slane %v262_v47, %v318_v37  ;;  %v253_v52 = vpop.xlane.xlu0 %252 }
  0xf5   : > { %v314_v54 = vsel %vm313_vm6, %v312_v49, %v307_v48  ;;  %v263_v55 = vmul.f32 0.00390625, %v253_v52  ;;  %v256_v56 = vpop.xlane.xlu1 %255 }
  0xf6   : > { %v264_v57 = vmul.f32 0.00390625, %v256_v56  ;;  %v321_v59 = vsel %vm320_vm7, %v319_v51, %v314_v54 }
  0xf7   : > { %v326_v58 = vrot.slane %v263_v55, %v325_v50 }
  0xf8   : > { %v333_v60 = vrot.slane %v264_v57, %v332_v53  ;;  %v211_v19 = vpop.xlane.xlu0 %210 }
  0xf9   : > { %v328_v61 = vsel %vm327_vm8, %v326_v58, %v321_v59  ;;  %v214_v16 = vpop.xlane.xlu1 %213 }
  0xfa   : > { %v335_v62 = vsel %vm334_vm9, %v333_v60, %v328_v61 }
  0xfb   : > { %664 = vmatmul.mubr.msk.f32.vlgmr.msra.gmra.mrb[0].mxu0 %vm336_vm0, %v335_v62 }
  0xfc   : > { %v217_v21 = vpop.xlane.xlu0 %216 }
  0xfd   : > { %v220_v20 = vpop.xlane.xlu1 %219 }
 0x100   : > { %v223_v23 = vpop.xlane.xlu0 %222 }
 0x101   : > { %v226_v22 = vpop.xlane.xlu1 %225 }
 0x104   : > { %v229_v27 = vpop.xlane.xlu0 %228 }
 0x105   : > { %v232_v26 = vpop.xlane.xlu1 %231 }
 0x1ce   : > { %v429_v1 = vpop.f32.mrb[0].mxu0 }
 0x1cf   : > { %v433_v2 = vsub.f32 0.0, %v429_v1  ;;  %v665_v3 = vpop.f32.mrb[1].mxu0 }
 0x1d1   : > { %v434_v6 = vmul.f32 1.442695, %v433_v2 }
 0x1d3   : > { %748 = vpow2.f32 %v434_v6 }
 0x1dd   : > { %v749_v8 = vpop.eup %748 }
 0x1de   : > { %v436_v9 = vadd.f32 1.0, %v749_v8 }
 0x1e0   : > { %750 = vrcp.f32 %v436_v9 }
 0x1ea   : > { %v751_v14 = vpop.eup %750 }
 0x1eb   : > { %v442_v15 = vrot.slane %v751_v14, %v441_v13 }
 0x1ed   : > { %448 = vbcast.lane.b32.xlu1 %v442_v15, 264  ;;  %444 = vbcast.lane.b32.xlu0 %v442_v15, 256 }
 0x1f1   : > { %452 = vbcast.lane.b32.xlu1 %v442_v15, 272  ;;  %460 = vbcast.lane.b32.xlu0 %v442_v15, 288 }
 0x1f5   : > { %456 = vbcast.lane.b32.xlu1 %v442_v15, 280  ;;  %468 = vbcast.lane.b32.xlu0 %v442_v15, 304 }
 0x1f9   : > { %464 = vbcast.lane.b32.xlu1 %v442_v15, 296 }
 0x1fd   : > { %472 = vbcast.lane.b32.xlu1 %v442_v15, 312 }
 0x25f   : > { %v449_v0 = vpop.permute.xlu1 %448  ;;  %v445_v28 = vpop.permute.xlu0 %444 }
 0x260   : > { %v475_v29 = vmul.f32 %v449_v0, %v214_v16  ;;  %v474_v32 = vmul.f32 %v445_v28, %v211_v19 }
 0x262   : > { %v484_v33 = vmin.f32 %v1079_v11, %v475_v29  ;;  %v485_v34 = vmin.f32 %v1081_v12, %v475_v29  ;;  %v482_v35 = vmin.f32 %v1068_v4, %v474_v32  ;;  %v483_v36 = vmin.f32 %v1070_v5, %v474_v32 }
 0x263   : > { %v453_v37 = vpop.permute.xlu1 %452  ;;  %v461_v40 = vpop.permute.xlu0 %460 }
 0x264   : > { %500 = vst [vmem:[%s1181_s15 + $0x10] sm:$0xff] %v484_v33  ;;  %501 = vst [vmem:[%s1181_s15 + $0x18] sm:$0xff] %v485_v34  ;;  %v476_v4 = vmul.f32 %v453_v37, %v217_v21  ;;  %v478_v11 = vmul.f32 %v461_v40, %v223_v23 }
 0x265   : > { %498 = vst [vmem:[%s1181_s15] sm:$0xff] %v482_v35  ;;  %499 = vst [vmem:[%s1181_s15 + $0x8] sm:$0xff] %v483_v36 }
 0x266   : > { %v486_v5 = vmin.f32 %v1073_v7, %v476_v4  ;;  %v487_v12 = vmin.f32 %v1077_v10, %v476_v4  ;;  %v490_v41 = vmin.f32 %v1099_v24, %v478_v11  ;;  %v491_v42 = vmin.f32 %v1101_v25, %v478_v11 }
 0x267   : > { %v457_v45 = vpop.permute.xlu1 %456  ;;  %v469_v46 = vpop.permute.xlu0 %468 }
 0x268   : > { %502 = vst [vmem:[%s1181_s15 + $0x20] sm:$0xff] %v486_v5  ;;  %503 = vst [vmem:[%s1181_s15 + $0x28] sm:$0xff] %v487_v12  ;;  %v477_v47 = vmul.f32 %v457_v45, %v220_v20  ;;  %v480_v7 = vmul.f32 %v469_v46, %v229_v27 }
 0x269   : > { %506 = vst [vmem:[%s1181_s15 + $0x40] sm:$0xff] %v490_v41  ;;  %507 = vst [vmem:[%s1181_s15 + $0x48] sm:$0xff] %v491_v42 }
 0x26a   : > { %v488_v10 = vmin.f32 %v1088_v17, %v477_v47  ;;  %v489_v24 = vmin.f32 %v1090_v18, %v477_v47  ;;  %v494_v25 = vmin.f32 %v1123_v38, %v480_v7  ;;  %v495_v48 = vmin.f32 %v1125_v39, %v480_v7 }
 0x26b   : > { %v465_v49 = vpop.permute.xlu1 %464 }
 0x26c   : > { %504 = vst [vmem:[%s1181_s15 + $0x30] sm:$0xff] %v488_v10  ;;  %505 = vst [vmem:[%s1181_s15 + $0x38] sm:$0xff] %v489_v24  ;;  %v479_v50 = vmul.f32 %v465_v49, %v226_v22 }
 0x26d   : > { %510 = vst [vmem:[%s1181_s15 + $0x60] sm:$0xff] %v494_v25  ;;  %511 = vst [vmem:[%s1181_s15 + $0x68] sm:$0xff] %v495_v48 }
 0x26e   : > { %v492_v51 = vmin.f32 %v1111_v30, %v479_v50  ;;  %v493_v17 = vmin.f32 %v1113_v31, %v479_v50 }
 0x26f   : > { %v473_v18 = vpop.permute.xlu1 %472 }
 0x270   : > { %508 = vst [vmem:[%s1181_s15 + $0x50] sm:$0xff] %v492_v51  ;;  %509 = vst [vmem:[%s1181_s15 + $0x58] sm:$0xff] %v493_v17  ;;  %v481_v38 = vmul.f32 %v473_v18, %v232_v26 }
 0x272   : > { %v496_v30 = vmin.f32 %v1130_v43, %v481_v38  ;;  %v497_v31 = vmin.f32 %v1132_v44, %v481_v38 }
 0x274   : > { %512 = vst [vmem:[%s1181_s15 + $0x70] sm:$0xff] %v496_v30  ;;  %513 = vst [vmem:[%s1181_s15 + $0x78] sm:$0xff] %v497_v31 }
 0x275   : > { %823 = shalt.err (!%p820_p7)
}
 0x276   : > { %s824_s18 = scalar_lea.hbm %s1212_s28, 2048  ;;  %s828_s20 = scalar_lea.hbm %s1264_s2, 4096 }
 0x277   : > { %p825_p9 = scmp.ne.s32.totalorder %s1212_s28, %s824_s18  ;;  %p829_p5 = scmp.lt.u32.totalorder %s1212_s28, %s1264_s2 }
 0x278   : > { %p830_p11 = scmp.lt.u32.totalorder %s828_s20, %s824_s18  ;;  %p832_p4 = scmp.lt.u32.totalorder %s824_s18, %s1212_s28 }
 0x279   : > { %p826_p2 = pnand %p825_p9, %p1000_p12 }
 0x27a   : > { %p831_p1 = por %p830_p11, %p829_p5 }
 0x27b   : > { %p827_p0 = pneg %p826_p2 }
 0x27c   : > { %p833_p6 = por %p832_p4, %p831_p1 }
 0x27e   : > { %p834_p8 = pnand %p833_p6, %p827_p0 }
 0x280   : > { %837 = shalt.err (!%p834_p8)
}
 0x281   : > { %s892_s30 = smov 256   ;;  %s893_s3 = smov 16  }
 0x282   : > { %688 = dma.vmem_to_hbm [thread:$0]  (%p1000_p12), %s1214_s27, 2048, %s1212_s28, %s515_s13, %s892_s30, %s892_s30, %s893_s3  }
 0x283 PF: > { %s543_s15 = sand.u32 1, %s868_s9   ;;  %p1281_p10 = scmp.ne.s32.totalorder %s1269_s16, 0 }
 0x284   : > { %p1282_p13 = scmp.ge.s32.totalorder %s880_s12, 2  ;;  %s544_s17 = scalar_lea.sflag [#allocation4], %s543_s15 }
 0x286   : > { %p699_p3 = pnand %p1282_p13, %p1281_p10 }
 0x288   : > { %863 = dma.done.wait (!%p699_p3), %s544_s17, 2048  }
 0x289   : > { %865 = vsyncadd (!%p699_p3), %s544_s17, 4294965248  ;;  %p16_p7 = scmp.ge.s32.totalorder %s965_s21, 4   ;;  %s1283_s9 = smov %s872_s10 }
 0x28a   : > { %s1284_s10 = smov %s876_s11  ;;  %s1285_s11 = smov %s996_s8 }
 0x28b   : > { %s1286_s12 = smov %s965_s21  ;;  %18 = sbr.rel (!%p16_p7) target bundleno = 6 (0x6), region = 77 }
 0x292   :  { %549 = vsyncpa [#allocation3], 1 }
 0x293   :  { %551 = vsyncpa [#allocation3 + $0x1], 1 }
 0x294   :  { %552 = vsyncpa [#allocation6], 1 }
 0x295   :  { %553 = vsyncpa [#allocation4], 1 }
 0x296   :  { %555 = vsyncpa [#allocation4 + $0x1], 1 }

</bundles_post_ra>
